<compile_context>
chip_gen: v6e
topology: v6e:2x2x1
jax: 0.10.0
libtpu: 0.0.40
codegen_flags: <defaults>
</compile_context>

<pallas_src>
import functools

import jax
import jax.numpy as jnp
from jax import lax
from jax.experimental import pallas as pl
from jax.experimental.pallas import tpu as pltpu

_VMEM_LIMIT = 32 * 1024 * 1024          # safe on v5e/v6e/v7x scoped VMEM


def _round_up(n, m):
    return ((n + m - 1) // m) * m


def _sublane_multiple(itemsize):
    # f32 -> 8 rows, bf16 -> 16, int8/fp8 -> 32 (sub-32-bit packs along sublanes).
    return 8 * max(1, 4 // int(itemsize))


# ---------------------------------------------------------------------------
# Fused single-pass kernel (small feature maps): one (N, TC, M) slab per grid
# step; stats + normalize + affine from the VMEM-resident copy.
# ---------------------------------------------------------------------------
def _bn_fused_kernel(x_ref, gamma_ref, beta_ref, o_ref, *, inv_count, eps):
    x = x_ref[...].astype(jnp.float32)                       # (N, TC, M)
    s = jnp.sum(jnp.sum(x, axis=2, keepdims=True), axis=0, keepdims=True)
    mean = s * inv_count                                     # (1, TC, 1)
    d = x - mean
    var = jnp.sum(jnp.sum(d * d, axis=2, keepdims=True), axis=0,
                  keepdims=True) * inv_count
    var = jnp.maximum(var, 0.0)
    inv_std = lax.rsqrt(var + eps)
    g = gamma_ref[...].astype(jnp.float32)                   # (1, TC, 1)
    b = beta_ref[...].astype(jnp.float32)
    o_ref[...] = (d * (g * inv_std) + b).astype(o_ref.dtype)


# ---------------------------------------------------------------------------
# Two-pass path, pass 1: per-(batch, channel) partial sum / sum-of-squares.
# Grid = (C_tiles [parallel], N [parallel], M_tiles [arbitrary]).
# ---------------------------------------------------------------------------
def _bn_stats_kernel(x_ref, psum_ref, psq_ref, sum_acc, sq_acc, *,
                     chunked, needs_mask, m_total, tm, unrolled):
    j = pl.program_id(2)

    @pl.when(j == 0)
    def _():
        sum_acc[...] = jnp.zeros_like(sum_acc)
        sq_acc[...] = jnp.zeros_like(sq_acc)

    if chunked:
        # Lane-wide (TC, 128) accumulator: VPU adds per 128-lane chunk, the
        # cross-lane XLU reduce is deferred to the finalize below.
        n_chunks = tm // 128
        rem = m_total - j * tm          # valid lanes in this block

        def add_chunk(start):
            xk = x_ref[:, pl.ds(start, 128)].astype(jnp.float32)   # (TC, 128)
            if needs_mask:
                lane = lax.broadcasted_iota(jnp.int32, xk.shape, 1)
                xk = jnp.where(lane < (rem - start), xk, 0.0)
            sum_acc[...] += xk
            sq_acc[...] += xk * xk

        if unrolled:
            for k in range(n_chunks):
                add_chunk(k * 128)
        else:
            def body(k, carry):
                add_chunk(pl.multiple_of(k * 128, 128))
                return carry
            lax.fori_loop(0, n_chunks, body, 0)
    else:
        # Full-M block (TM == M, not a 128 multiple): no tail, single reduce.
        x = x_ref[...].astype(jnp.float32)
        sum_acc[...] += jnp.sum(x, axis=1, keepdims=True)
        sq_acc[...] += jnp.sum(x * x, axis=1, keepdims=True)

    @pl.when(j == pl.num_programs(2) - 1)
    def _():
        psum_ref[...] = jnp.sum(sum_acc[...], axis=1, keepdims=True)
        psq_ref[...] = jnp.sum(sq_acc[...], axis=1, keepdims=True)


# ---------------------------------------------------------------------------
# Two-pass path, pass 2: y = x * scale[c] + shift[c].
# ---------------------------------------------------------------------------
def _bn_apply_kernel(x_ref, scale_ref, shift_ref, o_ref):
    x = x_ref[...].astype(jnp.float32)                        # (TC, TM)
    o_ref[...] = (x * scale_ref[...] + shift_ref[...]).astype(o_ref.dtype)


def batchnorm2d_pallas(x, gamma, beta, eps=1e-5, *,
                       block_bytes=4 * 1024 * 1024,
                       fused_block_bytes=4 * 1024 * 1024,
                       unroll_chunk_limit=8):
    """Training-mode BatchNorm2d forward on an NCHW tensor via Pallas."""
    N, C, H, W = x.shape
    M = H * W
    if N == 0 or C == 0 or M == 0:
        return x
    itemsize = jnp.dtype(x.dtype).itemsize
    sub = _sublane_multiple(itemsize)
    x3 = x.reshape(N, C, M)                 # free view, no transpose, no pad
    inv_count = 1.0 / float(N * M)
    gamma = gamma.astype(jnp.float32)
    beta = beta.astype(jnp.float32)
    eps = float(eps)

    # ---------------- fused single-pass path (small feature maps) ----------
    if fused_block_bytes:
        m_pad = _round_up(M, 128)
        bytes_per_row = N * m_pad * itemsize          # one padded channel row
        if _round_up(C, sub) * bytes_per_row <= fused_block_bytes:
            tc = C
        else:
            rows = (fused_block_bytes // bytes_per_row) // sub * sub
            tc = min(int(rows), C)
        if tc >= min(C, sub):
            gc = pl.cdiv(C, tc)
            out3 = pl.pallas_call(
                functools.partial(_bn_fused_kernel, inv_count=inv_count,
                                  eps=eps),
                out_shape=jax.ShapeDtypeStruct((N, C, M), x.dtype),
                grid=(gc,),
                in_specs=[pl.BlockSpec((N, tc, M), lambda i: (0, i, 0)),
                          pl.BlockSpec((1, tc, 1), lambda i: (0, i, 0)),
                          pl.BlockSpec((1, tc, 1), lambda i: (0, i, 0))],
                out_specs=pl.BlockSpec((N, tc, M), lambda i: (0, i, 0)),
                compiler_params=pltpu.CompilerParams(
                    dimension_semantics=("parallel",),
                    vmem_limit_bytes=_VMEM_LIMIT),
                cost_estimate=pl.CostEstimate(
                    flops=5 * N * C * M, transcendentals=C,
                    bytes_accessed=2 * x.size * itemsize),
            )(x3, gamma.reshape(1, C, 1), beta.reshape(1, C, 1))
            return out3.reshape(N, C, H, W)

    # ---------------- two-pass streaming path -------------------------------
    tc_cap = 256
    tc = C if C <= tc_cap else tc_cap - tc_cap % sub
    padded_tc = _round_up(tc, sub)
    tm_budget = max(128, block_bytes // (padded_tc * itemsize))
    tm = M if M <= tm_budget else (tm_budget // 128) * 128
    gc = pl.cdiv(C, tc)
    gm = pl.cdiv(M, tm)

    chunked = (tm % 128 == 0)
    needs_mask = chunked and (M % tm != 0)
    unrolled = chunked and (tm // 128) <= unroll_chunk_limit
    acc_lanes = 128 if chunked else 1

    psum, psq = pl.pallas_call(
        functools.partial(_bn_stats_kernel, chunked=chunked,
                          needs_mask=needs_mask, m_total=M, tm=tm,
                          unrolled=unrolled),
        out_shape=(jax.ShapeDtypeStruct((N, C, 1), jnp.float32),
                   jax.ShapeDtypeStruct((N, C, 1), jnp.float32)),
        grid=(gc, N, gm),
        in_specs=[pl.BlockSpec((None, tc, tm), lambda i, n, j: (n, i, j))],
        out_specs=(pl.BlockSpec((None, tc, 1), lambda i, n, j: (n, i, 0)),
                   pl.BlockSpec((None, tc, 1), lambda i, n, j: (n, i, 0))),
        scratch_shapes=[pltpu.VMEM((tc, acc_lanes), jnp.float32),
                        pltpu.VMEM((tc, acc_lanes), jnp.float32)],
        compiler_params=pltpu.CompilerParams(
            dimension_semantics=("parallel", "parallel", "arbitrary"),
            vmem_limit_bytes=_VMEM_LIMIT),
        cost_estimate=pl.CostEstimate(
            flops=3 * N * C * M, transcendentals=0,
            bytes_accessed=x.size * itemsize + 8 * N * C),
    )(x3)

    # Tiny cross-batch combine + affine folding in plain XLA (N*C floats).
    # NOTE: E[x^2]-E[x]^2 in f32 can lose precision when |mean| >> std over
    # very large N*H*W; acceptable for typical activation statistics.
    total = jnp.sum(psum[:, :, 0], axis=0)
    total_sq = jnp.sum(psq[:, :, 0], axis=0)
    mean = total * inv_count
    var = jnp.maximum(total_sq * inv_count - mean * mean, 0.0)
    inv_std = lax.rsqrt(var + eps)
    scale = gamma * inv_std
    shift = beta - mean * scale

    out3 = pl.pallas_call(
        _bn_apply_kernel,
        out_shape=jax.ShapeDtypeStruct((N, C, M), x.dtype),
        grid=(gc, N, gm),
        in_specs=[pl.BlockSpec((None, tc, tm), lambda i, n, j: (n, i, j)),
                  pl.BlockSpec((tc, 1), lambda i, n, j: (i, 0)),
                  pl.BlockSpec((tc, 1), lambda i, n, j: (i, 0))],
        out_specs=pl.BlockSpec((None, tc, tm), lambda i, n, j: (n, i, j)),
        compiler_params=pltpu.CompilerParams(
            dimension_semantics=("parallel", "parallel", "parallel"),
            vmem_limit_bytes=_VMEM_LIMIT),
        cost_estimate=pl.CostEstimate(
            flops=2 * N * C * M, transcendentals=0,
            bytes_accessed=2 * x.size * itemsize),
    )(x3, scale.reshape(C, 1), shift.reshape(C, 1))

    return out3.reshape(N, C, H, W)


class OctBatchNorm2d:
    """JAX/Pallas port of octconv._BatchNorm2d (forward, training-mode stats)."""

    def __init__(self, num_features, alpha_in=0, alpha_out=0, eps=1e-5,
                 momentum=0.1, affine=True, track_running_stats=True):
        hf_ch = int(num_features * (1 - alpha_out))
        lf_ch = num_features - hf_ch
        self.eps = eps
        # PyTorch default init: weight (gamma) = 1, bias (beta) = 0.
        self.gamma_h = jnp.ones((hf_ch,), jnp.float32)
        self.beta_h = jnp.zeros((hf_ch,), jnp.float32)
        self.gamma_l = jnp.ones((lf_ch,), jnp.float32)
        self.beta_l = jnp.zeros((lf_ch,), jnp.float32)
        # TODO(synk): running_mean/running_var EMA buffer updates (momentum)
        # are a training-time side effect and are not emitted here; the
        # training-mode forward output does not depend on them.

    def __call__(self, x):
        if isinstance(x, tuple):
            hf, lf = x
            hf = (batchnorm2d_pallas(hf, self.gamma_h, self.beta_h, self.eps)
                  if isinstance(hf, jnp.ndarray) else hf)
            lf = (batchnorm2d_pallas(lf, self.gamma_l, self.beta_l, self.eps)
                  if isinstance(lf, jnp.ndarray) else lf)
            return (hf, lf)
        return batchnorm2d_pallas(x, self.gamma_h, self.beta_h, self.eps)


if __name__ == "__main__":
    key = jax.random.PRNGKey(0)
    k_hf, k_lf, k_x, k_g, k_b, k_a, k_c = jax.random.split(key, 7)

    def bn_ref(x, gamma, beta, eps=1e-5):
        mean = jnp.mean(x, axis=(0, 2, 3), keepdims=True)
        var = jnp.var(x, axis=(0, 2, 3), keepdims=True)
        xhat = (x - mean) / jnp.sqrt(var + eps)
        return xhat * gamma.reshape(1, -1, 1, 1) + beta.reshape(1, -1, 1, 1)

    # Octave-conv style inputs: hf at full resolution, lf at half resolution.
    # Small enough to take the fused single-pass path.
    hf = jax.random.normal(k_hf, (2, 4, 16, 16), dtype=jnp.float32)
    lf = jax.random.normal(k_lf, (2, 4, 8, 8), dtype=jnp.float32)
    x_single = jax.random.normal(k_x, (2, 4, 16, 16), dtype=jnp.float32)

    # num_features=8, alpha_out=0.5 -> bnh over 4 channels, bnl over 4 channels.
    bn = OctBatchNorm2d(num_features=8, alpha_out=0.5)
    bn.gamma_h = jax.random.uniform(k_g, (4,), jnp.float32, 0.5, 1.5)
    bn.beta_h = 0.1 * jax.random.normal(k_b, (4,), dtype=jnp.float32)

    hf_out, lf_out = bn((hf, lf))
    hf_out = jax.block_until_ready(hf_out)
    lf_out = jax.block_until_ready(lf_out)

    # Single-tensor path (alpha_out=0 -> everything goes through bnh).
    bn_single = OctBatchNorm2d(num_features=4, alpha_out=0.0)
    y = jax.block_until_ready(bn_single(x_single))

    assert jnp.allclose(hf_out, bn_ref(hf, bn.gamma_h, bn.beta_h),
                        atol=1e-4, rtol=1e-4)
    assert jnp.allclose(lf_out, bn_ref(lf, bn.gamma_l, bn.beta_l),
                        atol=1e-4, rtol=1e-4)
    assert jnp.allclose(y, bn_ref(x_single, bn_single.gamma_h, bn_single.beta_h),
                        atol=1e-4, rtol=1e-4)
    assert hf_out.shape == hf.shape and lf_out.shape == lf.shape
    assert y.shape == x_single.shape and hf_out.dtype == hf.dtype

    # Exercise the two-pass streaming path (fused disabled), including ragged
    # channel / spatial tails handled fully in-kernel (no host pad/slice):
    #  a) chunked lane accumulation with a masked partial last spatial block
    #     (C=5 not a sublane multiple, M=3072 split into 2048+1024 blocks),
    xa = jax.random.normal(k_a, (2, 5, 48, 64), dtype=jnp.float32)
    ga = jax.random.uniform(k_g, (5,), jnp.float32, 0.5, 1.5)
    ba = 0.1 * jax.random.normal(k_b, (5,), dtype=jnp.float32)
    ya = jax.block_until_ready(
        batchnorm2d_pallas(xa, ga, ba, fused_block_bytes=0,
                           block_bytes=64 * 1024))
    assert jnp.allclose(ya, bn_ref(xa, ga, ba), atol=1e-4, rtol=1e-4)

    #  b) full-M block whose lane extent (100) is not a multiple of 128.
    xb = jax.random.normal(k_c, (2, 4, 10, 10), dtype=jnp.float32)
    gb = jnp.ones((4,), jnp.float32)
    bb = jnp.zeros((4,), jnp.float32)
    yb = jax.block_until_ready(
        batchnorm2d_pallas(xb, gb, bb, fused_block_bytes=0))
    assert jnp.allclose(yb, bn_ref(xb, gb, bb), atol=1e-4, rtol=1e-4)

    print("KERNEL_OK")
</pallas_src>

<mosaic_0001>
module attributes {stable_mosaic.version = 11 : i64} {
  func.func @_bn_fused_kernel(%arg0: i32, %arg1: memref<2x4x256xf32, #tpu.memory_space<vmem>>, %arg2: memref<1x4x1xf32, #tpu.memory_space<vmem>>, %arg3: memref<1x4x1xf32, #tpu.memory_space<vmem>>, %arg4: memref<2x4x256xf32, #tpu.memory_space<vmem>>) attributes {dimension_semantics = [#tpu.dimension_semantics<parallel>], iteration_bounds = array<i64: 1>, scalar_prefetch = 0 : i64, scratch_operands = 0 : i64, tpu.core_type = #tpu.core_type<tc>, window_params = [{transform_indices = @transform_0, window_bounds = array<i64: 2, 4, 256>}, {transform_indices = @transform_1, window_bounds = array<i64: 1, 4, 1>}, {transform_indices = @transform_2, window_bounds = array<i64: 1, 4, 1>}, {transform_indices = @transform_3, window_bounds = array<i64: 2, 4, 256>}]} {
    %c0 = arith.constant 0 : index
    %c0_0 = arith.constant 0 : index
    %c0_1 = arith.constant 0 : index
    %0 = vector.load %arg1[%c0, %c0_0, %c0_1] : memref<2x4x256xf32, #tpu.memory_space<vmem>>, vector<2x4x256xf32>
    %cst = arith.constant dense<0.000000e+00> : vector<2x4xf32>
    %1 = vector.multi_reduction <add>, %0, %cst [2] : vector<2x4x256xf32> to vector<2x4xf32>
    %2 = vector.shape_cast %1 : vector<2x4xf32> to vector<2x4x1xf32>
    %cst_2 = arith.constant dense<0.000000e+00> : vector<4x1xf32>
    %3 = vector.multi_reduction <add>, %2, %cst_2 [0] : vector<2x4x1xf32> to vector<4x1xf32>
    %4 = vector.shape_cast %3 : vector<4x1xf32> to vector<1x4x1xf32>
    %cst_3 = arith.constant 0.001953125 : f32
    %5 = vector.broadcast %cst_3 : f32 to vector<1x4x1xf32>
    %6 = arith.mulf %4, %5 : vector<1x4x1xf32>
    %7 = vector.broadcast %6 : vector<1x4x1xf32> to vector<2x4x256xf32>
    %8 = arith.subf %0, %7 : vector<2x4x256xf32>
    %9 = arith.mulf %8, %8 : vector<2x4x256xf32>
    %cst_4 = arith.constant dense<0.000000e+00> : vector<2x4xf32>
    %10 = vector.multi_reduction <add>, %9, %cst_4 [2] : vector<2x4x256xf32> to vector<2x4xf32>
    %11 = vector.shape_cast %10 : vector<2x4xf32> to vector<2x4x1xf32>
    %cst_5 = arith.constant dense<0.000000e+00> : vector<4x1xf32>
    %12 = vector.multi_reduction <add>, %11, %cst_5 [0] : vector<2x4x1xf32> to vector<4x1xf32>
    %13 = vector.shape_cast %12 : vector<4x1xf32> to vector<1x4x1xf32>
    %cst_6 = arith.constant 0.001953125 : f32
    %14 = vector.broadcast %cst_6 : f32 to vector<1x4x1xf32>
    %15 = arith.mulf %13, %14 : vector<1x4x1xf32>
    %cst_7 = arith.constant 0.000000e+00 : f32
    %16 = vector.broadcast %cst_7 : f32 to vector<1x4x1xf32>
    %17 = arith.maximumf %15, %16 : vector<1x4x1xf32>
    %cst_8 = arith.constant 9.99999974E-6 : f32
    %18 = vector.broadcast %cst_8 : f32 to vector<1x4x1xf32>
    %19 = arith.addf %17, %18 : vector<1x4x1xf32>
    %20 = math.rsqrt %19 : vector<1x4x1xf32>
    %c0_9 = arith.constant 0 : index
    %c0_10 = arith.constant 0 : index
    %c0_11 = arith.constant 0 : index
    %21 = vector.load %arg2[%c0_9, %c0_10, %c0_11] : memref<1x4x1xf32, #tpu.memory_space<vmem>>, vector<1x4x1xf32>
    %c0_12 = arith.constant 0 : index
    %c0_13 = arith.constant 0 : index
    %c0_14 = arith.constant 0 : index
    %22 = vector.load %arg3[%c0_12, %c0_13, %c0_14] : memref<1x4x1xf32, #tpu.memory_space<vmem>>, vector<1x4x1xf32>
    %23 = arith.mulf %21, %20 : vector<1x4x1xf32>
    %24 = vector.broadcast %23 : vector<1x4x1xf32> to vector<2x4x256xf32>
    %25 = arith.mulf %8, %24 : vector<2x4x256xf32>
    %26 = vector.broadcast %22 : vector<1x4x1xf32> to vector<2x4x256xf32>
    %27 = arith.addf %25, %26 : vector<2x4x256xf32>
    %c0_15 = arith.constant 0 : index
    %c0_16 = arith.constant 0 : index
    %c0_17 = arith.constant 0 : index
    %28 = vector.load %arg4[%c0_15, %c0_16, %c0_17] : memref<2x4x256xf32, #tpu.memory_space<vmem>>, vector<2x4x256xf32>
    tpu.vector_store %arg4[%c0_15, %c0_16, %c0_17], %27 {strides = array<i32>} : memref<2x4x256xf32, #tpu.memory_space<vmem>>, vector<2x4x256xf32>,
    return
  }
  func.func @transform_0(%arg0: i32) -> (i32, i32, i32) {
    %c0_i32 = arith.constant 0 : i32
    %c0_i32_0 = arith.constant 0 : i32
    %c0_i32_1 = arith.constant 0 : i32
    return %c0_i32, %arg0, %c0_i32_0 : i32, i32, i32
  }
  func.func @transform_1(%arg0: i32) -> (i32, i32, i32) {
    %c0_i32 = arith.constant 0 : i32
    %c0_i32_0 = arith.constant 0 : i32
    %c0_i32_1 = arith.constant 0 : i32
    return %c0_i32, %arg0, %c0_i32_0 : i32, i32, i32
  }
  func.func @transform_2(%arg0: i32) -> (i32, i32, i32) {
    %c0_i32 = arith.constant 0 : i32
    %c0_i32_0 = arith.constant 0 : i32
    %c0_i32_1 = arith.constant 0 : i32
    return %c0_i32, %arg0, %c0_i32_0 : i32, i32, i32
  }
  func.func @transform_3(%arg0: i32) -> (i32, i32, i32) {
    %c0_i32 = arith.constant 0 : i32
    %c0_i32_0 = arith.constant 0 : i32
    %c0_i32_1 = arith.constant 0 : i32
    return %c0_i32, %arg0, %c0_i32_0 : i32, i32, i32
  }
}

</mosaic_0001>

<bundles_post_ra>
// kernel: tpu_custom_call.1
= control target key start
LH: loop header
LB: loop body
LE: loop exit
PB: predicated region body
PF: predicated region fallthrough
CT: control target
= control target key end

     0   :  { %8 = vsyncpa [#allocation3], 0  ;;  %s250_s0 = inlined_call_operand.hbm [shape: f32[2,4,256], index: 0, kind: input, shape index: {}]   ;;  %s251_s1 = inlined_call_operand.vmem [shape: f32[1,4,1], index: 1, kind: input, shape index: {}]   ;;  %s252_s2 = inlined_call_operand.vmem [shape: f32[1,4,1], index: 2, kind: input, shape index: {}]   ;;  %s253_s3 = inlined_call_operand.hbm [shape: f32[2,4,256], index: 3, kind: output, shape index: {}]  }
   0x1   :  { %9 = vsyncpa [#allocation4], 0  ;;  %s194_s12 = smov [#allocation2]  }
   0x2   :  { %s15_s13 = sshll.u32 %s194_s12, 4  ;;  %s16_s13 = int_to_ptr.vmem [resolvable:$true] %s15_s13 }
   0x3   :  { %s158_s14 = scalar_lea.vmem %s16_s13, 256  ;;  %p163_p1 = scmp.lt.s32.totalorder %s16_s13, %s16_s13 }
   0x4   :  { %p159_p0 = scmp.ne.s32.totalorder %s16_s13, %s158_s14  ;;  %p164_p2 = scmp.lt.s32.totalorder %s158_s14, %s158_s14 }
   0x6   :  { %p165_p3 = por %p164_p2, %p163_p1 }
   0x8   :  { %p166_p4 = pnand %p165_p3, %p159_p0 }
   0xa   :  { %169 = shalt.err (!%p166_p4)
}
   0xb   :  { %s195_s15 = smov 128   ;;  %s196_s16 = smov 8  }
   0xc   :  { %21 = dma.hbm_to_vmem [thread:$0]  %s250_s0, 256, %s16_s13, [#allocation3], %s195_s15, %s195_s15, %s196_s16  }
   0xd   :  { %190 = dma.done.wait [#allocation3], 256  }
   0xe   :  { %191 = vsyncadd [#allocation3], 4294967040  ;;  %vm37_vm0 = vcmask 1043456   ;;  %v29_v0 = vld [vmem:[#allocation2] sm:$0xff]  ;;  %v30_v1 = vld [vmem:[#allocation2 + $0x8] sm:$0xff]  ;;  %v56_v12 = vlaneseq  ;;  %v198_v35 = vmov 0  }
   0xf   :  { %v33_v2 = vcombine.high %v29_v0, %v29_v0  ;;  %v38_v3 = vsel %vm37_vm0, %v29_v0, 0.0  ;;  %v34_v4 = vcombine.high %v30_v1, %v30_v1  ;;  %v43_v6 = vsel %vm37_vm0, %v30_v1, 0.0  ;;  %144 = vset.pattern.permute.xlu0 %v198_v35  ;;  %145 = vset.pattern.permute.xlu1 %v198_v35  ;;  %v89_v36 = vld [vmem:[%s252_s2] sm:$0xf]  ;;  %s199_s2 = smov [#allocation5]  }
  0x10   :  { %v197_v10 = vmov 839922192   ;;  %v57_v15 = vshrl.u32 %v56_v12, 7  ;;  %v88_v45 = vld [vmem:[%s251_s1] sm:$0xf]  ;;  %s126_s22 = sshll.u32 %s199_s2, 4  ;;  %s127_s22 = int_to_ptr.vmem [resolvable:$true] %s126_s22 }
  0x11   :  { %v39_v5 = vsel %vm37_vm0, %v33_v2, 0.0  ;;  %v44_v7 = vsel %vm37_vm0, %v34_v4, 0.0  ;;  %v54_v11 = vunpack.c.l.s4 %v197_v10  ;;  %s170_s23 = scalar_lea.vmem %s127_s22, 256  ;;  %p175_p6 = scmp.lt.s32.totalorder %s127_s22, %s127_s22 }
  0x12   :  { %v40_v8 = vadd.f32 %v39_v5, %v38_v3  ;;  %v45_v9 = vadd.f32 %v44_v7, %v43_v6  ;;  %p171_p5 = scmp.ne.s32.totalorder %s127_s22, %s170_s23  ;;  %p176_p7 = scmp.lt.s32.totalorder %s170_s23, %s170_s23 }
  0x13   :  { %v55_v14 = vunpack.c.0.s8 %v54_v11 }
  0x14   :  { %41 = vadd.xlane.f32.xlu0 %v40_v8  ;;  %p177_p8 = por %p176_p7, %p175_p6 }
  0x15   :  { %v58_v19 = vsub.s32 %v55_v14, %v57_v15 }
  0x16   :  { %p178_p9 = pnand %p177_p8, %p171_p5 }
  0x18   :  { %46 = vadd.xlane.f32.xlu0 %v45_v9 }
  0x9d   :  { %v42_v13 = vpop.xlane.xlu0 %41 }
  0x9e   :  { %v48_v17 = vsel %vm37_vm0, %v42_v13, 0.0 }
  0xa1   :  { %v47_v16 = vpop.xlane.xlu0 %46 }
  0xa2   :  { %v49_v18 = vsel %vm37_vm0, %v47_v16, 0.0 }
  0xa3   :  { %v50_v20 = vadd.f32 %v49_v18, %v48_v17 }
  0xa5   :  { %v51_v21 = vmul.f32 0.001953125, %v50_v20 }
  0xa7   :  { %v59_v22 = vrot.slane %v51_v21, %v58_v19 }
  0xa9   :  { %v62_v23 = vsub.f32 %v30_v1, %v59_v22  ;;  %v61_v24 = vsub.f32 %v29_v0, %v59_v22 }
  0xab   :  { %v63_v25 = vmul.f32 %v61_v24, %v61_v24  ;;  %v64_v26 = vmul.f32 %v62_v23, %v62_v23 }
  0xad   :  { %v67_v27 = vcombine.high %v63_v25, %v63_v25  ;;  %v68_v28 = vcombine.high %v64_v26, %v64_v26  ;;  %v71_v29 = vsel %vm37_vm0, %v63_v25, 0.0  ;;  %v76_v33 = vsel %vm37_vm0, %v64_v26, 0.0 }
  0xaf   :  { %v72_v30 = vsel %vm37_vm0, %v67_v27, 0.0  ;;  %v77_v32 = vsel %vm37_vm0, %v68_v28, 0.0 }
  0xb0   :  { %v73_v31 = vadd.f32 %v72_v30, %v71_v29  ;;  %v78_v34 = vadd.f32 %v77_v32, %v76_v33 }
  0xb2   :  { %74 = vadd.xlane.f32.xlu1 %v73_v31 }
  0xb6   :  { %79 = vadd.xlane.f32.xlu1 %v78_v34 }
  0xc7   :  { %107 = vperm.xlu1 %145, %v89_v36  }
 0x13b   :  { %v75_v37 = vpop.xlane.xlu1 %74 }
 0x13c   :  { %v81_v39 = vsel %vm37_vm0, %v75_v37, 0.0 }
 0x13f   :  { %v80_v38 = vpop.xlane.xlu1 %79 }
 0x140   :  { %v82_v40 = vsel %vm37_vm0, %v80_v38, 0.0 }
 0x141   :  { %v83_v41 = vadd.f32 %v82_v40, %v81_v39 }
 0x143   :  { %v84_v42 = vmul.f32 0.001953125, %v83_v41  ;;  %v108_v48 = vpop.permute.xlu1 %107 }
 0x144   :  { %v115_v51 = vrot.slane %v108_v48, %v58_v19 }
 0x145   :  { %v85_v43 = vmax.f32 %v84_v42, 0.0 }
 0x147   :  { %v86_v44 = vadd.f32 1e-05, %v85_v43 }
 0x149   :  { %148 = vrsqrt.f32 %v86_v44 }
 0x156   :  { %v149_v46 = vpop.eup %148 }
 0x157   :  { %v90_v47 = vmul.f32 %v149_v46, %v88_v45 }
 0x159   :  { %93 = vperm.xlu0 %144, %v90_v47  }
 0x1d4   :  { %v94_v49 = vpop.permute.xlu0 %93 }
 0x1d5   :  { %v101_v50 = vrot.slane %v94_v49, %v58_v19 }
 0x1d7   :  { %v103_v52 = vmul.f32 %v101_v50, %v61_v24  ;;  %v104_v53 = vmul.f32 %v101_v50, %v62_v23 }
 0x1d9   :  { %v117_v54 = vadd.f32 %v115_v51, %v103_v52  ;;  %v118_v55 = vadd.f32 %v115_v51, %v104_v53 }
 0x1db   :  { %119 = vst [vmem:[#allocation5] sm:$0xff] %v117_v54  ;;  %120 = vst [vmem:[#allocation5 + $0x8] sm:$0xff] %v118_v55 }
 0x1dc   :  { %181 = shalt.err (!%p178_p9)
}
 0x1dd   :  { %132 = dma.vmem_to_hbm [thread:$0]  %s127_s22, 256, %s253_s3, [#allocation4], %s195_s15, %s195_s15, %s196_s16  }
 0x1de   :  { %192 = dma.done.wait [#allocation4], 256  }
 0x1df   :  { %193 = vsyncadd [#allocation4], 4294967040 }
 0x1e0   :  { %136 = vsyncpa [#allocation3], 1 }
 0x1e1   :  { %137 = vsyncpa [#allocation4], 1 }

</bundles_post_ra>
